<compile_context>
chip_gen: v7x
topology: tpu7x:2x2x1
jax: 0.10.0
libtpu: 0.0.40
codegen_flags: <defaults>
</compile_context>

<pallas_src>
import functools
import math

import jax
import jax.numpy as jnp
from jax import lax
from jax.experimental import pallas as pl
from jax.experimental.pallas import tpu as pltpu


_NEG_LARGE = -1e30        # finite "-inf" for padded class lanes; exp() -> 0, so the
                          # softmax denominator is unchanged (padded lanes are sliced
                          # off before returning, so callers never see them).
_MIB = 1024 * 1024


def _round_up(x: int, m: int) -> int:
    return ((x + m - 1) // m) * m


def _cdiv(a: int, b: int) -> int:
    return (a + b - 1) // b


def _vmem_capacity_bytes() -> int:
    try:
        return int(pltpu.get_tpu_info().vmem_capacity_bytes)
    except Exception:
        return 64 * _MIB          # conservative: works on every generation


def _backbone_kernel(x_ref, w_ref, b_ref, probs_ref, logits_ref, acc_ref, *,
                     true_seq, ts, fold, d, inv_s):
    # grid = (batch_tiles, seq_tiles); seq is the trailing reduction axis.
    s = pl.program_id(1)
    num_s = pl.num_programs(1)

    # --- init the pooled-sum accumulator on the first seq tile --------------
    @pl.when(s == 0)
    def _():
        acc_ref[...] = jnp.zeros_like(acc_ref)

    # --- running sum over the (folded) intermediate axis ---------------------
    ragged_seq = (true_seq % ts) != 0          # static Python bool

    if ragged_seq:
        @pl.when(s < num_s - 1)
        def _():
            acc_ref[...] += jnp.sum(x_ref[...], axis=1, dtype=jnp.float32)

        @pl.when(s == num_s - 1)
        def _():
            # Mask the OOB sublanes of the ragged trailing tile before adding.
            xv = x_ref[...]
            seq_idx = s * ts + lax.broadcasted_iota(jnp.int32, (1, ts, 1), 1)
            xv = jnp.where(seq_idx < true_seq, xv, jnp.zeros_like(xv))
            acc_ref[...] += jnp.sum(xv, axis=1, dtype=jnp.float32)
    else:
        acc_ref[...] += jnp.sum(x_ref[...], axis=1, dtype=jnp.float32)

    # --- finalize on the last seq tile: fold -> mean -> linear -> softmax ----
    @pl.when(s == num_s - 1)
    def _():
        acc = acc_ref[...]                               # (TB, fold*D) f32
        pooled = acc[:, 0:d]
        for j in range(1, fold):                         # lane-fold back to (TB, D)
            pooled = pooled + acc[:, j * d:(j + 1) * d]
        pooled = pooled * inv_s                          # mean over true S

        w = w_ref[...].astype(jnp.float32)               # keep head matmul in f32
        logits = jnp.dot(pooled, w, preferred_element_type=jnp.float32)
        logits = logits + b_ref[...]                     # padded lanes ~= -1e30

        # Numerically-stable softmax; padded class lanes contribute exp(.) == 0.
        m = jnp.max(logits, axis=-1, keepdims=True)
        e = jnp.exp(logits - m)
        denom = jnp.sum(e, axis=-1, keepdims=True)
        probs = e * pl.reciprocal(denom, approx=False)   # exact: 1e-5 tol is contractual

        logits_ref[...] = logits.astype(logits_ref.dtype)
        probs_ref[...] = probs.astype(probs_ref.dtype)


def backbone_forward(features, weight, bias, *, max_batch_tile=128):
    """features: (B, *, D) -> (softmax_output (B, C), pre_softmax_features (B, C))."""
    B = features.shape[0]
    D = features.shape[-1]
    C = weight.shape[-1]

    # Flatten all intermediate dims into one "S" axis (S=1 if there are none).
    x = features.reshape(B, -1, D)
    S = x.shape[1]
    itemsize = jnp.dtype(x.dtype).itemsize
    w_itemsize = jnp.dtype(weight.dtype).itemsize

    # ---- lane folding: make the streaming tile lane-dense when D % 128 != 0.
    # (B, S, D) -> (B, S/k, k*D) is a pure bitcast reshape (no HBM copy).
    fold = 1
    if D % 128 != 0 and S > 1:
        fold = 128 // math.gcd(D, 128)
        while fold > 1 and S % fold != 0:
            fold //= 2
    if fold > 1:
        x = x.reshape(B, S // fold, fold * D)
    Sf = S // fold
    Df = fold * D

    # ---- batch tile ----------------------------------------------------------
    if B <= 8:
        TB = B                                    # exact full-batch block, no ragged rows
        # TODO(synk): for B <= 8 on v7x only one TensorCore streams the reduction;
        # a seq-split parallel axis + combine kernel would be needed to use both.
    else:
        TB = min(max_batch_tile, _round_up(B, 8))
        if _cdiv(B, TB) < 2:                      # >=2 parallel tiles -> v7x megacore
            TB = _round_up(_cdiv(B, 2), 8)

    # ---- lane-dense class dimension (pad only W/b — tiny) --------------------
    Cp = _round_up(C, 128)
    w_p = jnp.pad(weight, ((0, 0), (0, Cp - C)))
    b_p = jnp.pad(bias.reshape(1, C).astype(jnp.float32),
                  ((0, 0), (0, Cp - C)), constant_values=_NEG_LARGE)

    # ---- VMEM-budgeted seq tile (generation-aware) ---------------------------
    vmem_limit = max(32 * _MIB, int(_vmem_capacity_bytes() * 0.8))
    packing = {4: 8, 2: 16, 1: 32}.get(itemsize, 8)   # dtype-specific sublane multiple
    resident = (D * Cp * w_itemsize                   # weight (Buffered(1))
                + 8 * Cp * 4                          # bias   (Buffered(1), sublane-padded)
                + 2 * 2 * TB * Cp * 4                 # two f32 outputs, double-buffered
                + TB * Df * 4)                        # f32 accumulator scratch
    input_budget = vmem_limit - resident - 2 * _MIB   # headroom for Mosaic scratch
    ts_max = max(packing,
                 (input_budget // (2 * TB * Df * itemsize)) // packing * packing)
    TS = min(ts_max, _round_up(Sf, packing))
    if TS >= Sf:
        TS = Sf                                       # single exact block, no masking

    grid = (_cdiv(B, TB), _cdiv(Sf, TS))

    kernel = functools.partial(_backbone_kernel, true_seq=Sf, ts=TS,
                               fold=fold, d=D, inv_s=float(1.0 / S))

    cost = pl.CostEstimate(
        flops=int(2 * B * D * Cp + B * S * D),
        transcendentals=int(B * Cp),
        bytes_accessed=int(B * S * D * itemsize + D * Cp * w_itemsize
                           + Cp * 4 + 2 * B * Cp * 4),
    )

    probs, logits = pl.pallas_call(
        kernel,
        out_shape=(
            jax.ShapeDtypeStruct((B, Cp), jnp.float32),
            jax.ShapeDtypeStruct((B, Cp), jnp.float32),
        ),
        grid_spec=pltpu.PrefetchScalarGridSpec(
            num_scalar_prefetch=0,
            grid=grid,
            in_specs=[
                pl.BlockSpec((TB, TS, Df), lambda b, s: (b, s, 0)),
                pl.BlockSpec((D, Cp), lambda b, s: (0, 0),
                             pipeline_mode=pl.Buffered(1)),
                pl.BlockSpec((1, Cp), lambda b, s: (0, 0),
                             pipeline_mode=pl.Buffered(1)),
            ],
            out_specs=[
                pl.BlockSpec((TB, Cp), lambda b, s: (b, 0)),
                pl.BlockSpec((TB, Cp), lambda b, s: (b, 0)),
            ],
            scratch_shapes=[pltpu.VMEM((TB, Df), jnp.float32)],
        ),
        compiler_params=pltpu.CompilerParams(
            dimension_semantics=("parallel", "arbitrary"),
            vmem_limit_bytes=vmem_limit,
        ),
        cost_estimate=cost,
    )(x, w_p, b_p)

    # Strip class-lane padding (batch is never padded).
    return probs[:, :C], logits[:, :C]


def _check(features, weight, bias):
    out, pre_softmax = backbone_forward(features, weight, bias)
    jax.block_until_ready((out, pre_softmax))

    B = features.shape[0]
    C = weight.shape[-1]
    pooled_ref = jnp.mean(features.reshape(B, -1, features.shape[-1]), axis=1)
    logits_ref = pooled_ref @ weight + bias
    probs_ref = jax.nn.softmax(logits_ref, axis=-1)
    assert out.shape == (B, C)
    assert pre_softmax.shape == (B, C)
    assert jnp.allclose(pre_softmax, logits_ref, atol=1e-5)
    assert jnp.allclose(out, probs_ref, atol=1e-5)


if __name__ == "__main__":
    # Small shapes consistent with the contract: (batch_size, *, input_size)
    batch_size, seq, input_size, class_count = 2, 8, 32, 10

    key = jax.random.PRNGKey(0)
    k_x, k_w, k_b, k_y = jax.random.split(key, 4)

    # Deterministic synthetic parameters (no checkpoint loading).
    weight = jax.random.normal(k_w, (input_size, class_count), dtype=jnp.float32) * 0.05
    bias = jax.random.normal(k_b, (class_count,), dtype=jnp.float32) * 0.01

    # Case 1: single intermediate dim (exercises the lane-folding path, D=32 -> k=4).
    features = jax.random.normal(k_x, (batch_size, seq, input_size), dtype=jnp.float32)
    _check(features, weight, bias)

    # Case 2: multiple intermediate dims (the '*' in the contract), no folding.
    features2 = jax.random.normal(k_y, (batch_size, 3, 5, input_size), dtype=jnp.float32)
    _check(features2, weight, bias)

    print("KERNEL_OK")
</pallas_src>

<mosaic_0001>
module attributes {stable_mosaic.version = 11 : i64} {
  func.func @_backbone_kernel(%arg0: i32, %arg1: i32, %arg2: memref<2x2x128xf32, #tpu.memory_space<vmem>>, %arg3: memref<32x128xf32, #tpu.memory_space<vmem>>, %arg4: memref<1x128xf32, #tpu.memory_space<vmem>>, %arg5: memref<2x128xf32, #tpu.memory_space<vmem>>, %arg6: memref<2x128xf32, #tpu.memory_space<vmem>>, %arg7: memref<2x128xf32, #tpu.memory_space<vmem>>) attributes {dimension_semantics = [#tpu.dimension_semantics<parallel>, #tpu.dimension_semantics<arbitrary>], iteration_bounds = array<i64: 1, 1>, scalar_prefetch = 0 : i64, scratch_operands = 1 : i64, tpu.core_type = #tpu.core_type<tc>, window_params = [{transform_indices = @transform_0, window_bounds = array<i64: 2, 2, 128>}, {pipeline_mode = #tpu.pipeline_mode<synchronous>, transform_indices = @transform_1, window_bounds = array<i64: 32, 128>}, {pipeline_mode = #tpu.pipeline_mode<synchronous>, transform_indices = @transform_2, window_bounds = array<i64: 1, 128>}, {transform_indices = @transform_3, window_bounds = array<i64: 2, 128>}, {transform_indices = @transform_4, window_bounds = array<i64: 2, 128>}]} {
    %c0_i32 = arith.constant 0 : i32
    %0 = arith.cmpi eq, %arg1, %c0_i32 : i32
    %1 = arith.extui %0 : i1 to i32
    %c0_i32_0 = arith.constant 0 : i32
    %2 = arith.cmpi ne, %1, %c0_i32_0 : i32
    scf.if %2 {
      %cst_9 = arith.constant 0.000000e+00 : f32
      %11 = vector.broadcast %cst_9 : f32 to vector<2x128xf32>
      %c0_10 = arith.constant 0 : index
      %c0_11 = arith.constant 0 : index
      %12 = vector.load %arg7[%c0_10, %c0_11] : memref<2x128xf32, #tpu.memory_space<vmem>>, vector<2x128xf32>
      tpu.vector_store %arg7[%c0_10, %c0_11], %11 {strides = array<i32>} : memref<2x128xf32, #tpu.memory_space<vmem>>, vector<2x128xf32>,
    } else {
    }
    %c0 = arith.constant 0 : index
    %c0_1 = arith.constant 0 : index
    %3 = vector.load %arg7[%c0, %c0_1] : memref<2x128xf32, #tpu.memory_space<vmem>>, vector<2x128xf32>
    %c0_2 = arith.constant 0 : index
    %c0_3 = arith.constant 0 : index
    %c0_4 = arith.constant 0 : index
    %4 = vector.load %arg2[%c0_2, %c0_3, %c0_4] : memref<2x2x128xf32, #tpu.memory_space<vmem>>, vector<2x2x128xf32>
    %cst = arith.constant dense<0.000000e+00> : vector<2x128xf32>
    %5 = vector.multi_reduction <add>, %4, %cst [1] : vector<2x2x128xf32> to vector<2x128xf32>
    %6 = arith.addf %3, %5 : vector<2x128xf32>
    %c0_5 = arith.constant 0 : index
    %c0_6 = arith.constant 0 : index
    %7 = vector.load %arg7[%c0_5, %c0_6] : memref<2x128xf32, #tpu.memory_space<vmem>>, vector<2x128xf32>
    tpu.vector_store %arg7[%c0_5, %c0_6], %6 {strides = array<i32>} : memref<2x128xf32, #tpu.memory_space<vmem>>, vector<2x128xf32>,
    %c0_i32_7 = arith.constant 0 : i32
    %8 = arith.cmpi eq, %arg1, %c0_i32_7 : i32
    %9 = arith.extui %8 : i1 to i32
    %c0_i32_8 = arith.constant 0 : i32
    %10 = arith.cmpi ne, %9, %c0_i32_8 : i32
    scf.if %10 {
      %c0_9 = arith.constant 0 : index
      %c0_10 = arith.constant 0 : index
      %11 = vector.load %arg7[%c0_9, %c0_10] : memref<2x128xf32, #tpu.memory_space<vmem>>, vector<2x128xf32>
      %12 = vector.extract_strided_slice %11 {offsets = [0, 0], sizes = [2, 32], strides = [1, 1]} : vector<2x128xf32> to vector<2x32xf32>
      %13 = vector.extract_strided_slice %11 {offsets = [0, 32], sizes = [2, 32], strides = [1, 1]} : vector<2x128xf32> to vector<2x32xf32>
      %14 = arith.addf %12, %13 : vector<2x32xf32>
      %15 = vector.extract_strided_slice %11 {offsets = [0, 64], sizes = [2, 32], strides = [1, 1]} : vector<2x128xf32> to vector<2x32xf32>
      %16 = arith.addf %14, %15 : vector<2x32xf32>
      %17 = vector.extract_strided_slice %11 {offsets = [0, 96], sizes = [2, 32], strides = [1, 1]} : vector<2x128xf32> to vector<2x32xf32>
      %18 = arith.addf %16, %17 : vector<2x32xf32>
      %cst_11 = arith.constant 1.250000e-01 : f32
      %19 = vector.broadcast %cst_11 : f32 to vector<2x32xf32>
      %20 = arith.mulf %18, %19 : vector<2x32xf32>
      %c0_12 = arith.constant 0 : index
      %c0_13 = arith.constant 0 : index
      %21 = vector.load %arg3[%c0_12, %c0_13] : memref<32x128xf32, #tpu.memory_space<vmem>>, vector<32x128xf32>
      %cst_14 = arith.constant dense<0.000000e+00> : vector<2x128xf32>
      %22 = tpu.matmul %20, %21, %cst_14 {dimension_numbers = #tpu.dot_dimension_numbers<[1], [0], [0], [1], [0, 0, 1, 1], [], []>} : vector<2x32xf32>, vector<32x128xf32>, vector<2x128xf32> -> vector<2x128xf32>
      %c0_15 = arith.constant 0 : index
      %c0_16 = arith.constant 0 : index
      %23 = vector.load %arg4[%c0_15, %c0_16] : memref<1x128xf32, #tpu.memory_space<vmem>>, vector<1x128xf32>
      %24 = vector.broadcast %23 : vector<1x128xf32> to vector<2x128xf32>
      %25 = arith.addf %22, %24 : vector<2x128xf32>
      %cst_17 = arith.constant dense<0xFF800000> : vector<2xf32>
      %26 = vector.multi_reduction <maximumf>, %25, %cst_17 [1] : vector<2x128xf32> to vector<2xf32>
      %27 = vector.shape_cast %26 : vector<2xf32> to vector<2x1xf32>
      %28 = vector.broadcast %27 : vector<2x1xf32> to vector<2x128xf32>
      %29 = arith.subf %25, %28 : vector<2x128xf32>
      %30 = math.exp %29 : vector<2x128xf32>
      %cst_18 = arith.constant dense<0.000000e+00> : vector<2xf32>
      %31 = vector.multi_reduction <add>, %30, %cst_18 [1] : vector<2x128xf32> to vector<2xf32>
      %32 = vector.shape_cast %31 : vector<2xf32> to vector<2x1xf32>
      %33 = tpu.reciprocal %32 : vector<2x1xf32> -> vector<2x1xf32>
      %34 = vector.broadcast %33 : vector<2x1xf32> to vector<2x128xf32>
      %35 = arith.mulf %30, %34 : vector<2x128xf32>
      %c0_19 = arith.constant 0 : index
      %c0_20 = arith.constant 0 : index
      %36 = vector.load %arg6[%c0_19, %c0_20] : memref<2x128xf32, #tpu.memory_space<vmem>>, vector<2x128xf32>
      tpu.vector_store %arg6[%c0_19, %c0_20], %25 {strides = array<i32>} : memref<2x128xf32, #tpu.memory_space<vmem>>, vector<2x128xf32>,
      %c0_21 = arith.constant 0 : index
      %c0_22 = arith.constant 0 : index
      %37 = vector.load %arg5[%c0_21, %c0_22] : memref<2x128xf32, #tpu.memory_space<vmem>>, vector<2x128xf32>
      tpu.vector_store %arg5[%c0_21, %c0_22], %35 {strides = array<i32>} : memref<2x128xf32, #tpu.memory_space<vmem>>, vector<2x128xf32>,
    } else {
    }
    return
  }
  func.func @transform_0(%arg0: i32, %arg1: i32) -> (i32, i32, i32) {
    %c0_i32 = arith.constant 0 : i32
    %c0_i32_0 = arith.constant 0 : i32
    return %arg0, %arg1, %c0_i32 : i32, i32, i32
  }
  func.func @transform_1(%arg0: i32, %arg1: i32) -> (i32, i32) {
    %c0_i32 = arith.constant 0 : i32
    %c0_i32_0 = arith.constant 0 : i32
    %c0_i32_1 = arith.constant 0 : i32
    return %c0_i32, %c0_i32_0 : i32, i32
  }
  func.func @transform_2(%arg0: i32, %arg1: i32) -> (i32, i32) {
    %c0_i32 = arith.constant 0 : i32
    %c0_i32_0 = arith.constant 0 : i32
    %c0_i32_1 = arith.constant 0 : i32
    return %c0_i32, %c0_i32_0 : i32, i32
  }
  func.func @transform_3(%arg0: i32, %arg1: i32) -> (i32, i32) {
    %c0_i32 = arith.constant 0 : i32
    %c0_i32_0 = arith.constant 0 : i32
    return %arg0, %c0_i32 : i32, i32
  }
  func.func @transform_4(%arg0: i32, %arg1: i32) -> (i32, i32) {
    %c0_i32 = arith.constant 0 : i32
    %c0_i32_0 = arith.constant 0 : i32
    return %arg0, %c0_i32 : i32, i32
  }
}

</mosaic_0001>

<bundles_post_ra>
// kernel: tpu_custom_call.1
= control target key start
LH: loop header
LB: loop body
LE: loop exit
PB: predicated region body
PF: predicated region fallthrough
CT: control target
= control target key end

     0   :  { %10 = vsyncpa [#allocation4], 0  ;;  %s455_s0 = inlined_call_operand.hbm [shape: f32[2,2,128], index: 0, kind: input, shape index: {}]   ;;  %s456_s1 = inlined_call_operand.hbm [shape: f32[32,128], index: 1, kind: input, shape index: {}]   ;;  %s457_s2 = inlined_call_operand.vmem [shape: f32[1,128], index: 2, kind: input, shape index: {}]   ;;  %s458_s3 = inlined_call_operand.hbm [shape: f32[2,128], index: 3, kind: output, shape index: {0}]   ;;  %s459_s4 = inlined_call_operand.hbm [shape: f32[2,128], index: 4, kind: output, shape index: {1}]  }
   0x1   :  { %11 = vsyncpa [#allocation7], 0 }
   0x2   :  { %12 = vsyncpa [#allocation5], 0 }
   0x3   :  { %13 = vsyncpa [#allocation10], 0  ;;  %s359_s15 = smov [#allocation3]   ;;  %s263_s19 = scalar_lea.hbm %s455_s0, 64 }
   0x4   :  { %s19_s16 = sshll.u32 %s359_s15, 4  ;;  %p264_p0 = scmp.ne.s32.totalorder %s455_s0, %s263_s19  ;;  %s20_s16 = int_to_ptr.vmem [resolvable:$true] %s19_s16 }
   0x5   :  { %p267_p1 = scmp.lt.u32.totalorder %s263_s19, %s455_s0 }
   0x7   :  { %p269_p2 = pnand %p267_p1, %p264_p0 }
   0x9   :  { %272 = shalt.err (!%p269_p2)
}
   0xa   :  { %s273_s24 = scalar_lea.vmem %s20_s16, 64  ;;  %p278_p4 = scmp.lt.s32.totalorder %s20_s16, %s20_s16 }
   0xb   :  { %p274_p3 = scmp.ne.s32.totalorder %s20_s16, %s273_s24  ;;  %p279_p5 = scmp.lt.s32.totalorder %s273_s24, %s273_s24 }
   0xd   :  { %p280_p6 = por %p279_p5, %p278_p4 }
   0xf   :  { %p281_p7 = pnand %p280_p6, %p274_p3 }
  0x11   :  { %284 = shalt.err (!%p281_p7)
}
  0x12   :  { %s360_s25 = smov 32   ;;  %s361_s26 = smov 2  }
  0x13   :  { %25 = dma.hbm_to_vmem [thread:$0]  %s455_s0, 64, %s20_s16, [#allocation4], %s360_s25, %s360_s25, %s361_s26  }
  0x14   :  { %s362_s29 = smov [#allocation6]   ;;  %s285_s7 = scalar_lea.hbm %s456_s1, 512 }
  0x15   :  { %s31_s30 = sshll.u32 %s362_s29, 4  ;;  %p286_p8 = scmp.ne.s32.totalorder %s456_s1, %s285_s7  ;;  %s32_s30 = int_to_ptr.vmem [resolvable:$true] %s31_s30 }
  0x16   :  { %p289_p9 = scmp.lt.u32.totalorder %s285_s7, %s456_s1 }
  0x18   :  { %p291_p10 = pnand %p289_p9, %p286_p8 }
  0x1a   :  { %294 = shalt.err (!%p291_p10)
}
  0x1b   :  { %s295_s12 = scalar_lea.vmem %s32_s30, 512  ;;  %p300_p12 = scmp.lt.s32.totalorder %s32_s30, %s32_s30 }
  0x1c   :  { %p296_p11 = scmp.ne.s32.totalorder %s32_s30, %s295_s12  ;;  %p301_p13 = scmp.lt.s32.totalorder %s295_s12, %s295_s12 }
  0x1e   :  { %p302_p0 = por %p301_p13, %p300_p12 }
  0x20   :  { %p303_p1 = pnand %p302_p0, %p296_p11 }
  0x22   :  { %306 = shalt.err (!%p303_p1)
}
  0x23   :  { %s363_s0 = smov 128   ;;  %s364_s13 = smov 8  }
  0x24   :  { %37 = dma.hbm_to_vmem [thread:$0]  %s456_s1, 512, %s32_s30, [#allocation7], %s363_s0, %s363_s0, %s364_s13  }
  0x25   :  { %351 = dma.done.wait [#allocation4], 64  }
  0x26   :  { %352 = vsyncadd [#allocation4], 4294967232 }
  0x27   :  { %353 = dma.done.wait [#allocation7], 512  }
  0x28   :  { %354 = vsyncadd [#allocation7], 4294966784  ;;  %v365_v0 = vmov 0.0   ;;  %vm54_vm0 = vcmask 1041408   ;;  %v52_v1 = vld [vmem:[#allocation3] sm:$0x3] }
  0x29   :  { %50 = vst [vmem:[#allocation2] sm:$0x3] %v365_v0  ;;  %v53_v2 = vld [vmem:[#allocation3 + $0x2] sm:$0x3]  ;;  %v55_v3 = vsel %vm54_vm0, %v52_v1, 0.0  ;;  %vm71_vm1 = vcmask 1041409  }
  0x2a   :  { %v62_v4 = vsel %vm54_vm0, %v53_v2, 0.0  ;;  %v56_v5 = vrot.slane %v55_v3, 4  ;;  %v94_v18 = vld [vmem:[#allocation6] sm:$0xff]  ;;  %v95_v19 = vld [vmem:[#allocation6 + $0x8] sm:$0xff]  ;;  %v366_v20 = vmov 0.0|0.0   ;;  %v96_v24 = vld [vmem:[#allocation6 + $0x10] sm:$0xff] }
  0x2b   :  { %v63_v6 = vrot.slane %v62_v4, 4  ;;  %240 = vmatprep.subr.bf16.mxu0 %v366_v20  ;;  %v241_v21 = vpack.c.bf16 %v95_v19, %v94_v18  ;;  %v97_v25 = vld [vmem:[#allocation6 + $0x18] sm:$0xff]  ;;  %vm367_vm2 = vmmov 0   ;;  %s368_s1 = smov 96   ;;  %s369_s16 = smov 64   ;;  %vm105_vm3 = vcmask 261120  }
  0x2c   :  { %v57_v7 = vadd.f32 %v56_v5, %v55_v3  ;;  %v244_v26 = vpack.c.bf16 %v97_v25, %v96_v24  ;;  %237 = vmatprep.mubr.msk.f32.mxu0 %vm367_vm2, %v365_v0  ;;  %v222_v35 = vld [vmem:[%s457_s2] ss:$0 sm:$0xff]  ;;  %s370_s19 = smov [#allocation9]  }
  0x2d   :  { %v64_v8 = vadd.f32 %v63_v6, %v62_v4  ;;  %242 = vmatpush3.bf16.msra.mxu0 %v241_v21  ;;  %s208_s20 = sshll.u32 %s370_s19, 4  ;;  %s209_s20 = int_to_ptr.vmem [resolvable:$true] %s208_s20 }
  0x2e   :  { %v58_v9 = vrot.slane %v57_v7, 2  ;;  %243 = vmatprep.subr.bf16.mxu0 %v366_v20  ;;  %s307_s21 = scalar_lea.vmem %s209_s20, 32  ;;  %p312_p3 = scmp.lt.s32.totalorder %s209_s20, %s209_s20 }
  0x2f   :  { %v65_v10 = vrot.slane %v64_v8, 2  ;;  %p308_p2 = scmp.ne.s32.totalorder %s209_s20, %s307_s21  ;;  %p313_p4 = scmp.lt.s32.totalorder %s307_s21, %s307_s21 }
  0x30   :  { %v59_v11 = vadd.f32 %v58_v9, %v57_v7  ;;  %v51_v15 = vld [vmem:[#allocation2] sm:$0x3] }
  0x31   :  { %v66_v12 = vadd.f32 %v65_v10, %v64_v8  ;;  %245 = vmatpush3.bf16.msra.mxu0 %v244_v26  ;;  %p314_p5 = por %p313_p4, %p312_p3 }
  0x32   :  { %v60_v13 = vrot.slane %v59_v11, 1 }
  0x33   :  { %v67_v14 = vrot.slane %v66_v12, 1  ;;  %p315_p6 = pnand %p314_p5, %p308_p2 }
  0x34   :  { %v61_v16 = vadd.f32 %v60_v13, %v59_v11 }
  0x35   :  { %v68_v17 = vadd.f32 %v67_v14, %v66_v12 }
  0x37   :  { %v72_v22 = vsel %vm71_vm1, %v68_v17, %v61_v16 }
  0x38   :  { %v74_v23 = vadd.f32 %v72_v22, %v51_v15 }
  0x3a   :  { %75 = vst [vmem:[#allocation2] sm:$0x3] %v74_v23 }
  0x41   :  { %v79_v27 = vld [vmem:[#allocation2] sm:$0x3] }
  0x42   :  { %81 = vrot.lane.b32.xlu0 %v79_v27, %s368_s1  ;;  %89 = vrot.lane.b32.xlu1 %v79_v27, %s360_s25 }
  0x46   :  { %85 = vrot.lane.b32.xlu0 %v79_v27, %s369_s16 }
  0xb4   :  { %v82_v28 = vpop.permute.xlu0 %81  ;;  %v90_v31 = vpop.permute.xlu1 %89 }
  0xb5   :  { %v84_v29 = vadd.f32 %v82_v28, %v79_v27 }
  0xb8   :  { %v86_v30 = vpop.permute.xlu0 %85 }
  0xb9   :  { %v88_v32 = vadd.f32 %v86_v30, %v84_v29 }
  0xbb   :  { %v92_v33 = vadd.f32 %v90_v31, %v88_v32 }
  0xbd   :  { %v93_v34 = vmul.f32 0.125, %v92_v33 }
  0xbf   :  { %238 = vmatmul.mubr.msk.f32.vlgmr.msra.gmra.mrb[0].mxu0 %vm105_vm3, %v93_v34 }
 0x192   :  { %v175_v36 = vpop.f32.mrb[0].mxu0 }
 0x193   :  { %v176_v37 = vadd.f32 %v222_v35, %v175_v36  ;;  %v239_v38 = vpop.f32.mrb[1].mxu0 }
 0x195   :  { %190 = vst [vmem:[#allocation9] sm:$0x3] %v176_v37  ;;  %v179_v39 = vsel %vm54_vm0, %v176_v37, -inf }
 0x196   :  { %180 = vmax.xlane.f32.xlu1 %v179_v39 }
 0x223   :  { %v181_v40 = vpop.xlane.xlu1 %180 }
 0x224   :  { %v182_v41 = vsub.f32 %v176_v37, %v181_v40 }
 0x226   :  { %v183_v42 = vmul.f32 1.442695, %v182_v41 }
 0x228   :  { %259 = vpow2.f32 %v183_v42 }
 0x232   :  { %v260_v43 = vpop.eup %259 }
 0x233   :  { %v185_v44 = vsel %vm54_vm0, %v260_v43, 0.0 }
 0x234   :  { %186 = vadd.xlane.f32.xlu0 %v185_v44 }
 0x235   :  { %318 = shalt.err (!%p315_p6)
}
 0x236   :  { %s319_s23 = scalar_lea.hbm %s459_s4, 32 }
 0x237   :  { %p320_p7 = scmp.ne.s32.totalorder %s459_s4, %s319_s23  ;;  %p323_p8 = scmp.lt.u32.totalorder %s319_s23, %s459_s4 }
 0x239   :  { %p325_p9 = pnand %p323_p8, %p320_p7 }
 0x23b   :  { %328 = shalt.err (!%p325_p9)
}
 0x23c   :  { %211 = dma.vmem_to_hbm [thread:$0]  %s209_s20, 32, %s459_s4, [#allocation10]  }
 0x23d   :  { %s371_s30 = smov [#allocation8]  }
 0x23e   :  { %s198_s5 = sshll.u32 %s371_s30, 4  ;;  %s199_s5 = int_to_ptr.vmem [resolvable:$true] %s198_s5 }
 0x23f   :  { %s329_s6 = scalar_lea.vmem %s199_s5, 32  ;;  %p334_p11 = scmp.lt.s32.totalorder %s199_s5, %s199_s5 }
 0x240   :  { %p330_p10 = scmp.ne.s32.totalorder %s199_s5, %s329_s6  ;;  %p335_p12 = scmp.lt.s32.totalorder %s329_s6, %s329_s6 }
 0x242   :  { %p336_p13 = por %p335_p12, %p334_p11 }
 0x244   :  { %p337_p0 = pnand %p336_p13, %p330_p10 }
 0x2c1   :  { %v187_v45 = vpop.xlane.xlu0 %186 }
 0x2c2   :  { %261 = vrcp.f32 %v187_v45 }
 0x2cc   :  { %v262_v46 = vpop.eup %261 }
 0x2cd   :  { %v189_v47 = vmul.f32 %v262_v46, %v260_v43 }
 0x2cf   :  { %191 = vst [vmem:[#allocation8] sm:$0x3] %v189_v47 }
 0x2d0   :  { %340 = shalt.err (!%p337_p0)
}
 0x2d1   :  { %s341_s9 = scalar_lea.hbm %s458_s3, 32 }
 0x2d2   :  { %p342_p1 = scmp.ne.s32.totalorder %s458_s3, %s341_s9  ;;  %p345_p2 = scmp.lt.u32.totalorder %s341_s9, %s458_s3 }
 0x2d4   :  { %p347_p3 = pnand %p345_p2, %p342_p1 }
 0x2d6   :  { %350 = shalt.err (!%p347_p3)
}
 0x2d7   :  { %201 = dma.vmem_to_hbm [thread:$0]  %s199_s5, 32, %s458_s3, [#allocation5]  }
 0x2d8   :  { %355 = dma.done.wait [#allocation5], 32  }
 0x2d9   :  { %356 = vsyncadd [#allocation5], 4294967264 }
 0x2da   :  { %357 = dma.done.wait [#allocation10], 32  }
 0x2db   :  { %358 = vsyncadd [#allocation10], 4294967264 }
 0x2dc   :  { %218 = vsyncpa [#allocation4], 1 }
 0x2dd   :  { %219 = vsyncpa [#allocation7], 1 }
 0x2de   :  { %220 = vsyncpa [#allocation5], 1 }
 0x2df   :  { %221 = vsyncpa [#allocation10], 1 }

</bundles_post_ra>
